<compile_context>
chip_gen: v6e
topology: v6e:2x2x1
jax: 0.10.0
libtpu: 0.0.40
codegen_flags: <defaults>
</compile_context>

<pallas_src>
import numpy as np
import jax
import jax.numpy as jnp
from jax.experimental import pallas as pl
from jax.experimental.pallas import tpu as pltpu


# ----------------------------------------------------------------------------
# Host-side slab packing (one-time)
# ----------------------------------------------------------------------------
def _pack_rows(arrays, ncols=None):
    """Stack 2-D arrays along rows into one zero-padded f32 slab.

    Returns (slab, offsets) with offsets[i] = (row_start, nrows, ncols_valid),
    STATIC Python ints the kernel uses for zero-cost ref slicing.
    """
    arrays = [np.asarray(a, np.float32) for a in arrays]
    if ncols is None:
        ncols = max(a.shape[1] for a in arrays)
    rows = sum(a.shape[0] for a in arrays)
    rows_pad = ((rows + 7) // 8) * 8          # sublane-friendly row count
    slab = np.zeros((rows_pad, ncols), np.float32)
    offsets, r = [], 0
    for a in arrays:
        h, w = a.shape
        slab[r:r + h, :w] = a
        offsets.append((r, h, w))
        r += h
    return slab, tuple(offsets)


# ----------------------------------------------------------------------------
# Single fused Pallas kernel: entire encode() forward
# ----------------------------------------------------------------------------
def _make_forward_kernel(p_offs, g_offs):
    def _view(ref, off):
        r, h, w = off
        return ref[r:r + h, :w]          # static slice of a VMEM ref

    def kernel(p_ref, g_ref, x0_ref, xout_ref):
        f32 = jnp.float32

        (w0_p0, w1_p0, w0_p1a, w1_p1, w_lin,
         sh0_p0, sh1_p0, sh1_p1, b_lin) = [_view(p_ref, o) for o in p_offs]
        (a0, x, pool0, a1, pool1, bias0_p1) = [_view(g_ref, o) for o in g_offs]

        def mm(a, b):
            return jnp.dot(a, b, preferred_element_type=f32)

        def softmax(z):
            m = jnp.max(z, axis=-1, keepdims=True)
            e = jnp.exp(z - m)
            return e / jnp.sum(e, axis=-1, keepdims=True)   # exact: rows sum to 1

        # -------------------- pool 0 --------------------
        # conv0+bn(+relu) -> conv1+bn -> weighted-mean pool -> linear -> softmax
        # (BN scale pre-folded into the weights; only the shift remains.)
        h = jnp.maximum(mm(mm(a0, x), w0_p0) + sh0_p0, 0.0)
        h = mm(mm(a0, h), w1_p0) + sh1_p0
        h = mm(pool0, h)                                    # weighted global_mean_pool
        # TODO(synk): ClassifierBase internals not given; approximated as one Linear.
        x0 = softmax(mm(h, w_lin) + b_lin)
        x0_ref[...] = x0

        # -------------------- pool 1 --------------------
        # Original: x1 = concat([x0, x_pool1], 1); conv0_pool1(x1) = (A1 @ x1) @ W0.
        # Equivalent with the weight split + host-precomputed rank-1 bias:
        #   (A1 @ x0) @ W0a_scaled + bias0_p1,
        #   bias0_p1 = (A1 @ x_pool1) @ W0b_scaled + shift0_p1     (host, one-time)
        h1 = jnp.maximum(mm(mm(a1, x0), w0_p1a) + bias0_p1, 0.0)
        h1 = mm(mm(a1, h1), w1_p1) + sh1_p1
        h1 = mm(pool1, h1)                                  # weighted global_mean_pool
        # use_lin_pool1 = False -> softmax directly over hidden features
        xout_ref[...] = softmax(h1)

    return kernel


# ----------------------------------------------------------------------------
# One-time host folding + packing, then the jitted pallas_call
# ----------------------------------------------------------------------------
def prepare_kernel_inputs(params, data):
    """One-time host work (constant fold, not per-call wrapper work):
      * BN scale folded into conv weights (only shifts remain),
      * rank-1 (A1 @ x_pool1) @ W0b term folded into a (N1, H) bias,
      * everything packed into a parameter slab + a graph-operator slab."""
    f = lambda k: np.asarray(params[k], np.float32)
    d = lambda k: np.asarray(data[k], np.float32)

    w0_p0 = f("w0_p0") * f("scale0_p0")
    w1_p0 = f("w1_p0") * f("scale1_p0")
    w0_p1a = f("w0_p1_a") * f("scale0_p1")
    w0_p1b = f("w0_p1_b") * f("scale0_p1")
    w1_p1 = f("w1_p1") * f("scale1_p1")

    a1 = d("adj_norm_pool1")
    bias0_p1 = (a1 @ d("x_pool1")) @ w0_p1b + f("shift0_p1")        # (N1, H)

    p_slab, p_offs = _pack_rows([
        w0_p0, w1_p0, w0_p1a, w1_p1, f("w_lin_p0"),
        f("shift0_p0"), f("shift1_p0"), f("shift1_p1"), f("b_lin_p0")])
    g_slab, g_offs = _pack_rows([
        d("adj_norm_pool0"), d("x"), d("pool_mat_pool0"),
        a1, d("pool_mat_pool1"), bias0_p1])

    n1 = data["pool_mat_pool0"].shape[0]
    b = data["pool_mat_pool1"].shape[0]
    hid = params["w1_p0"].shape[1]
    c = params["w_lin_p0"].shape[1]
    return (jnp.asarray(p_slab), jnp.asarray(g_slab), p_offs, g_offs,
            (n1, c), (b, hid))


def build_forward_fn(params, data):
    """Returns (jitted forward fn, param slab, graph slab)."""
    p_slab, g_slab, p_offs, g_offs, x0_shape, xout_shape = \
        prepare_kernel_inputs(params, data)
    kernel = _make_forward_kernel(p_offs, g_offs)

    n0, f_in = data["x"].shape
    n1, c = x0_shape
    b, hid = xout_shape
    flops = 2 * (n0 * n0 * f_in + n0 * f_in * hid          # conv0_pool0
                 + n0 * n0 * hid + n0 * hid * hid          # conv1_pool0
                 + n1 * n0 * hid                           # pool0
                 + n1 * hid * c                            # lin_pool0
                 + n1 * n1 * c + n1 * c * hid              # conv0_pool1 (split)
                 + n1 * n1 * hid + n1 * hid * hid          # conv1_pool1
                 + b * n1 * hid)                           # pool1
    transcendentals = n1 * c + b * hid                     # exps
    bytes_accessed = 4 * (int(p_slab.size) + int(g_slab.size) + n1 * c + b * hid)

    call = pl.pallas_call(
        kernel,
        out_shape=(jax.ShapeDtypeStruct(x0_shape, jnp.float32),
                   jax.ShapeDtypeStruct(xout_shape, jnp.float32)),
        in_specs=[pl.BlockSpec(memory_space=pltpu.MemorySpace.VMEM),
                  pl.BlockSpec(memory_space=pltpu.MemorySpace.VMEM)],
        out_specs=(pl.BlockSpec(memory_space=pltpu.MemorySpace.VMEM),
                   pl.BlockSpec(memory_space=pltpu.MemorySpace.VMEM)),
        cost_estimate=pl.CostEstimate(flops=int(flops),
                                      transcendentals=int(transcendentals),
                                      bytes_accessed=int(bytes_accessed)),
    )
    # TODO(synk): at real graph sizes, add a leading "parallel" grid axis over
    # graph batches (v7x megacore), make outputs lane-dense (128 lanes), cast
    # matmul operands to bf16 on v6e/v7x, and re-derive A-tiles for v7x's
    # 64 MiB VMEM; at these toy shapes a single whole-array block is optimal.
    return jax.jit(call), p_slab, g_slab


# ----------------------------------------------------------------------------
# Host-side graph operators and parameter construction (one-time)
# ----------------------------------------------------------------------------
def gcn_norm_adj(edge_index, num_nodes, add_self_loops=True):
    """Dense D^{-1/2}(A + I)D^{-1/2} (PyG GCNConv gcn_norm, unit edge weights)."""
    a = np.zeros((num_nodes, num_nodes), dtype=np.float32)
    src, dst = edge_index
    a[dst, src] = 1.0  # message j -> i lands in row i
    if add_self_loops:
        a = a + np.eye(num_nodes, dtype=np.float32)
    deg = a.sum(axis=1)
    d_inv_sqrt = 1.0 / np.sqrt(np.maximum(deg, 1e-12))
    return (d_inv_sqrt[:, None] * a * d_inv_sqrt[None, :]).astype(np.float32)


def weighted_mean_pool_matrix(pool_vec, weights, num_groups):
    """P[g, i] = w_i / sum_{j in g} w_j (weighted global_mean_pool as a matrix)."""
    pool_vec = np.asarray(pool_vec)
    weights = np.asarray(weights, dtype=np.float32)
    onehot = (np.arange(num_groups)[:, None] == pool_vec[None, :]).astype(np.float32)
    p = onehot * weights[None, :]
    denom = np.maximum(p.sum(axis=1, keepdims=True), 1e-12)
    return (p / denom).astype(np.float32)


def fold_conv_bn(conv_bias, bn_gamma, bn_beta, bn_mean, bn_var, eps=1e-5):
    """Fold GCNConv bias + eval-mode BatchNorm1d into per-channel (scale, shift)."""
    scale = bn_gamma / np.sqrt(bn_var + eps)
    shift = bn_beta - bn_mean * scale + conv_bias * scale
    return (scale.reshape(1, -1).astype(np.float32),
            shift.reshape(1, -1).astype(np.float32))


def glorot(key, shape):
    fan_in, fan_out = shape
    lim = float(np.sqrt(6.0 / (fan_in + fan_out)))
    return jax.random.uniform(key, shape, jnp.float32, -lim, lim)


def build_params(key, f_in, hidden, n_classes, num_node_features_pool1=1):
    keys = jax.random.split(key, 8)

    def bn_scale_shift(cout, seed):
        # non-trivial eval-mode BN stats so the fold is actually exercised
        rng = np.random.default_rng(seed)
        bias = rng.normal(0.0, 0.05, cout).astype(np.float32)      # GCNConv bias
        gamma = (1.0 + 0.1 * rng.normal(size=cout)).astype(np.float32)
        beta = rng.normal(0.0, 0.05, cout).astype(np.float32)
        mean = rng.normal(0.0, 0.1, cout).astype(np.float32)
        var = (1.0 + 0.1 * rng.uniform(size=cout)).astype(np.float32)
        return fold_conv_bn(bias, gamma, beta, mean, var)

    p = {}
    p["w0_p0"] = glorot(keys[0], (f_in, hidden))
    p["scale0_p0"], p["shift0_p0"] = bn_scale_shift(hidden, 1)
    p["w1_p0"] = glorot(keys[1], (hidden, hidden))
    p["scale1_p0"], p["shift1_p0"] = bn_scale_shift(hidden, 2)

    # first pool-1 conv weight, pre-split so the kernel never needs the concat
    w0_p1 = glorot(keys[2], (n_classes + num_node_features_pool1, hidden))
    p["w0_p1_a"] = w0_p1[:n_classes]                 # acts on x_0      (C, H)
    p["w0_p1_b"] = w0_p1[n_classes:]                 # acts on x_pool1  (1, H)
    p["scale0_p1"], p["shift0_p1"] = bn_scale_shift(hidden, 3)
    p["w1_p1"] = glorot(keys[3], (hidden, hidden))
    p["scale1_p1"], p["shift1_p1"] = bn_scale_shift(hidden, 4)

    p["w_lin_p0"] = glorot(keys[4], (hidden, n_classes))
    p["b_lin_p0"] = 0.01 * jax.random.normal(keys[5], (1, n_classes), jnp.float32)
    return {k: jnp.asarray(v, jnp.float32) for k, v in p.items()}


def build_data(key):
    n0, f_in = 16, 8          # nodes / node features
    n1 = 4                    # super-nodes (pool1 groups)
    b = 2                     # graphs in batch

    keys = jax.random.split(key, 4)
    x = jax.random.normal(keys[0], (n0, f_in), jnp.float32)

    # pool0 graph: undirected ring over 16 nodes; pool1 graph: ring over 4 super-nodes
    src = np.arange(n0); dst = (src + 1) % n0
    edge_index_pool0 = np.stack([np.concatenate([src, dst]),
                                 np.concatenate([dst, src])])
    src1 = np.arange(n1); dst1 = (src1 + 1) % n1
    edge_index_pool1 = np.stack([np.concatenate([src1, dst1]),
                                 np.concatenate([dst1, src1])])

    pool1_vec = np.repeat(np.arange(n1), n0 // n1)          # node -> super-node
    batch_pool1 = np.repeat(np.arange(b), n1 // b)          # super-node -> graph

    node_weight_pool0 = np.asarray(
        jax.random.uniform(keys[1], (n0,), jnp.float32, 0.5, 1.5))
    node_weight_pool1 = np.asarray(
        jax.random.uniform(keys[2], (n1,), jnp.float32, 0.5, 1.5))

    x_pool1 = jax.random.normal(keys[3], (n1, 1), jnp.float32)

    data = {
        "x": x,
        "x_pool1": x_pool1,
        "adj_norm_pool0": jnp.asarray(gcn_norm_adj(edge_index_pool0, n0)),
        "adj_norm_pool1": jnp.asarray(gcn_norm_adj(edge_index_pool1, n1)),
        "pool_mat_pool0": jnp.asarray(
            weighted_mean_pool_matrix(pool1_vec, node_weight_pool0, n1)),
        "pool_mat_pool1": jnp.asarray(
            weighted_mean_pool_matrix(batch_pool1, node_weight_pool1, b)),
    }
    shapes = {
        "x": list(x.shape),
        "edge_index_pool0": list(edge_index_pool0.shape),
        "pool1": [n0],
        "node_weight_pool0": [n0],
        "x_pool1": list(x_pool1.shape),
        "edge_index_pool1": list(edge_index_pool1.shape),
        "node_weight_pool1": [n1],
    }
    return data, shapes


# ----------------------------------------------------------------------------
# Pure-JAX reference (same math, explicit concat, unfolded BN) for correctness
# ----------------------------------------------------------------------------
def reference_forward(params, data):
    def gcn(a, h, w, sc, sh, relu):
        y = (a @ h) @ w * sc + sh
        return jnp.maximum(y, 0.0) if relu else y

    x = gcn(data["adj_norm_pool0"], data["x"], params["w0_p0"],
            params["scale0_p0"], params["shift0_p0"], True)
    x = gcn(data["adj_norm_pool0"], x, params["w1_p0"],
            params["scale1_p0"], params["shift1_p0"], False)
    x = data["pool_mat_pool0"] @ x
    x = x @ params["w_lin_p0"] + params["b_lin_p0"]
    x0 = jax.nn.softmax(x, axis=-1)

    w0_p1 = jnp.concatenate([params["w0_p1_a"], params["w0_p1_b"]], axis=0)
    x1 = jnp.concatenate([x0, data["x_pool1"]], axis=1)
    x1 = gcn(data["adj_norm_pool1"], x1, w0_p1,
             params["scale0_p1"], params["shift0_p1"], True)
    x1 = gcn(data["adj_norm_pool1"], x1, params["w1_p1"],
             params["scale1_p1"], params["shift1_p1"], False)
    x1 = data["pool_mat_pool1"] @ x1
    return x0, jax.nn.softmax(x1, axis=-1)


if __name__ == "__main__":
    f_in, hidden, n_classes = 8, 16, 4

    key = jax.random.PRNGKey(0)
    k_data, k_params = jax.random.split(key)
    data, _ = build_data(k_data)
    params = build_params(k_params, f_in, hidden, n_classes)

    fwd, p_slab, g_slab = build_forward_fn(params, data)
    x_0, x_out = fwd(p_slab, g_slab)
    x_0 = jax.block_until_ready(x_0)
    x_out = jax.block_until_ready(x_out)

    assert x_0.shape == (4, n_classes)
    assert x_out.shape == (2, hidden)
    assert bool(jnp.all(jnp.isfinite(x_0))) and bool(jnp.all(jnp.isfinite(x_out)))
    # rows of an (exact) softmax must sum to 1
    assert bool(jnp.allclose(jnp.sum(x_0, axis=1), 1.0, atol=1e-3))
    assert bool(jnp.allclose(jnp.sum(x_out, axis=1), 1.0, atol=1e-3))

    # match the unfused pure-JAX reference (validates BN-fold, weight-split
    # concat removal, rank-1 bias fold, and slab packing)
    r0, rout = reference_forward(params, data)
    assert bool(jnp.allclose(x_0, r0, atol=1e-3, rtol=1e-3))
    assert bool(jnp.allclose(x_out, rout, atol=1e-3, rtol=1e-3))

    print("KERNEL_OK")
</pallas_src>

<mosaic_0001>
module attributes {stable_mosaic.version = 11 : i64} {
  func.func @kernel(%arg0: memref<64x16xf32, #tpu.memory_space<vmem>>, %arg1: memref<48x16xf32, #tpu.memory_space<vmem>>, %arg2: memref<4x4xf32, #tpu.memory_space<vmem>>, %arg3: memref<2x16xf32, #tpu.memory_space<vmem>>) attributes {dimension_semantics = [], scalar_prefetch = 0 : i64, scratch_operands = 0 : i64, tpu.core_type = #tpu.core_type<tc>} {
    %c0 = arith.constant 0 : index
    %c0_0 = arith.constant 0 : index
    %0 = vector.load %arg0[%c0, %c0_0] : memref<64x16xf32, #tpu.memory_space<vmem>>, vector<8x16xf32>
    %c8 = arith.constant 8 : index
    %c0_1 = arith.constant 0 : index
    %1 = vector.load %arg0[%c8, %c0_1] : memref<64x16xf32, #tpu.memory_space<vmem>>, vector<16x16xf32>
    %c24 = arith.constant 24 : index
    %c0_2 = arith.constant 0 : index
    %2 = vector.load %arg0[%c24, %c0_2] : memref<64x16xf32, #tpu.memory_space<vmem>>, vector<4x16xf32>
    %c28 = arith.constant 28 : index
    %c0_3 = arith.constant 0 : index
    %3 = vector.load %arg0[%c28, %c0_3] : memref<64x16xf32, #tpu.memory_space<vmem>>, vector<16x16xf32>
    %c44 = arith.constant 44 : index
    %c0_4 = arith.constant 0 : index
    %4 = vector.load %arg0[%c44, %c0_4] : memref<64x16xf32, #tpu.memory_space<vmem>>, vector<16x4xf32>
    %c60 = arith.constant 60 : index
    %c0_5 = arith.constant 0 : index
    %5 = vector.load %arg0[%c60, %c0_5] : memref<64x16xf32, #tpu.memory_space<vmem>>, vector<1x16xf32>
    %c61 = arith.constant 61 : index
    %c0_6 = arith.constant 0 : index
    %6 = vector.load %arg0[%c61, %c0_6] : memref<64x16xf32, #tpu.memory_space<vmem>>, vector<1x16xf32>
    %c62 = arith.constant 62 : index
    %c0_7 = arith.constant 0 : index
    %7 = vector.load %arg0[%c62, %c0_7] : memref<64x16xf32, #tpu.memory_space<vmem>>, vector<1x16xf32>
    %c63 = arith.constant 63 : index
    %c0_8 = arith.constant 0 : index
    %8 = vector.load %arg0[%c63, %c0_8] : memref<64x16xf32, #tpu.memory_space<vmem>>, vector<1x4xf32>
    %c0_9 = arith.constant 0 : index
    %c0_10 = arith.constant 0 : index
    %9 = vector.load %arg1[%c0_9, %c0_10] : memref<48x16xf32, #tpu.memory_space<vmem>>, vector<16x16xf32>
    %c16 = arith.constant 16 : index
    %c0_11 = arith.constant 0 : index
    %10 = vector.load %arg1[%c16, %c0_11] : memref<48x16xf32, #tpu.memory_space<vmem>>, vector<16x8xf32>
    %c32 = arith.constant 32 : index
    %c0_12 = arith.constant 0 : index
    %11 = vector.load %arg1[%c32, %c0_12] : memref<48x16xf32, #tpu.memory_space<vmem>>, vector<4x16xf32>
    %c36 = arith.constant 36 : index
    %c0_13 = arith.constant 0 : index
    %12 = vector.load %arg1[%c36, %c0_13] : memref<48x16xf32, #tpu.memory_space<vmem>>, vector<4x4xf32>
    %c40 = arith.constant 40 : index
    %c0_14 = arith.constant 0 : index
    %13 = vector.load %arg1[%c40, %c0_14] : memref<48x16xf32, #tpu.memory_space<vmem>>, vector<2x4xf32>
    %c42 = arith.constant 42 : index
    %c0_15 = arith.constant 0 : index
    %14 = vector.load %arg1[%c42, %c0_15] : memref<48x16xf32, #tpu.memory_space<vmem>>, vector<4x16xf32>
    %cst = arith.constant dense<0.000000e+00> : vector<16x8xf32>
    %15 = tpu.matmul %9, %10, %cst {dimension_numbers = #tpu.dot_dimension_numbers<[1], [0], [0], [1], [0, 0, 1, 1], [], []>} : vector<16x16xf32>, vector<16x8xf32>, vector<16x8xf32> -> vector<16x8xf32>
    %cst_16 = arith.constant dense<0.000000e+00> : vector<16x16xf32>
    %16 = tpu.matmul %15, %0, %cst_16 {dimension_numbers = #tpu.dot_dimension_numbers<[1], [0], [0], [1], [0, 0, 1, 1], [], []>} : vector<16x8xf32>, vector<8x16xf32>, vector<16x16xf32> -> vector<16x16xf32>
    %17 = vector.broadcast %5 : vector<1x16xf32> to vector<16x16xf32>
    %18 = arith.addf %16, %17 : vector<16x16xf32>
    %cst_17 = arith.constant 0.000000e+00 : f32
    %19 = vector.broadcast %cst_17 : f32 to vector<16x16xf32>
    %20 = arith.maximumf %18, %19 : vector<16x16xf32>
    %cst_18 = arith.constant dense<0.000000e+00> : vector<16x16xf32>
    %21 = tpu.matmul %9, %20, %cst_18 {dimension_numbers = #tpu.dot_dimension_numbers<[1], [0], [0], [1], [0, 0, 1, 1], [], []>} : vector<16x16xf32>, vector<16x16xf32>, vector<16x16xf32> -> vector<16x16xf32>
    %cst_19 = arith.constant dense<0.000000e+00> : vector<16x16xf32>
    %22 = tpu.matmul %21, %1, %cst_19 {dimension_numbers = #tpu.dot_dimension_numbers<[1], [0], [0], [1], [0, 0, 1, 1], [], []>} : vector<16x16xf32>, vector<16x16xf32>, vector<16x16xf32> -> vector<16x16xf32>
    %23 = vector.broadcast %6 : vector<1x16xf32> to vector<16x16xf32>
    %24 = arith.addf %22, %23 : vector<16x16xf32>
    %cst_20 = arith.constant dense<0.000000e+00> : vector<4x16xf32>
    %25 = tpu.matmul %11, %24, %cst_20 {dimension_numbers = #tpu.dot_dimension_numbers<[1], [0], [0], [1], [0, 0, 1, 1], [], []>} : vector<4x16xf32>, vector<16x16xf32>, vector<4x16xf32> -> vector<4x16xf32>
    %cst_21 = arith.constant dense<0.000000e+00> : vector<4x4xf32>
    %26 = tpu.matmul %25, %4, %cst_21 {dimension_numbers = #tpu.dot_dimension_numbers<[1], [0], [0], [1], [0, 0, 1, 1], [], []>} : vector<4x16xf32>, vector<16x4xf32>, vector<4x4xf32> -> vector<4x4xf32>
    %27 = vector.broadcast %8 : vector<1x4xf32> to vector<4x4xf32>
    %28 = arith.addf %26, %27 : vector<4x4xf32>
    %cst_22 = arith.constant dense<0xFF800000> : vector<4xf32>
    %29 = vector.multi_reduction <maximumf>, %28, %cst_22 [1] : vector<4x4xf32> to vector<4xf32>
    %30 = vector.shape_cast %29 : vector<4xf32> to vector<4x1xf32>
    %31 = vector.broadcast %30 : vector<4x1xf32> to vector<4x4xf32>
    %32 = arith.subf %28, %31 : vector<4x4xf32>
    %33 = math.exp %32 : vector<4x4xf32>
    %cst_23 = arith.constant dense<0.000000e+00> : vector<4xf32>
    %34 = vector.multi_reduction <add>, %33, %cst_23 [1] : vector<4x4xf32> to vector<4xf32>
    %35 = vector.shape_cast %34 : vector<4xf32> to vector<4x1xf32>
    %36 = vector.broadcast %35 : vector<4x1xf32> to vector<4x4xf32>
    %37 = arith.divf %33, %36 : vector<4x4xf32>
    %c0_24 = arith.constant 0 : index
    %c0_25 = arith.constant 0 : index
    %38 = vector.load %arg2[%c0_24, %c0_25] : memref<4x4xf32, #tpu.memory_space<vmem>>, vector<4x4xf32>
    tpu.vector_store %arg2[%c0_24, %c0_25], %37 {strides = array<i32>} : memref<4x4xf32, #tpu.memory_space<vmem>>, vector<4x4xf32>,
    %cst_26 = arith.constant dense<0.000000e+00> : vector<4x4xf32>
    %39 = tpu.matmul %12, %37, %cst_26 {dimension_numbers = #tpu.dot_dimension_numbers<[1], [0], [0], [1], [0, 0, 1, 1], [], []>} : vector<4x4xf32>, vector<4x4xf32>, vector<4x4xf32> -> vector<4x4xf32>
    %cst_27 = arith.constant dense<0.000000e+00> : vector<4x16xf32>
    %40 = tpu.matmul %39, %2, %cst_27 {dimension_numbers = #tpu.dot_dimension_numbers<[1], [0], [0], [1], [0, 0, 1, 1], [], []>} : vector<4x4xf32>, vector<4x16xf32>, vector<4x16xf32> -> vector<4x16xf32>
    %41 = arith.addf %40, %14 : vector<4x16xf32>
    %cst_28 = arith.constant 0.000000e+00 : f32
    %42 = vector.broadcast %cst_28 : f32 to vector<4x16xf32>
    %43 = arith.maximumf %41, %42 : vector<4x16xf32>
    %cst_29 = arith.constant dense<0.000000e+00> : vector<4x16xf32>
    %44 = tpu.matmul %12, %43, %cst_29 {dimension_numbers = #tpu.dot_dimension_numbers<[1], [0], [0], [1], [0, 0, 1, 1], [], []>} : vector<4x4xf32>, vector<4x16xf32>, vector<4x16xf32> -> vector<4x16xf32>
    %cst_30 = arith.constant dense<0.000000e+00> : vector<4x16xf32>
    %45 = tpu.matmul %44, %3, %cst_30 {dimension_numbers = #tpu.dot_dimension_numbers<[1], [0], [0], [1], [0, 0, 1, 1], [], []>} : vector<4x16xf32>, vector<16x16xf32>, vector<4x16xf32> -> vector<4x16xf32>
    %46 = vector.broadcast %7 : vector<1x16xf32> to vector<4x16xf32>
    %47 = arith.addf %45, %46 : vector<4x16xf32>
    %cst_31 = arith.constant dense<0.000000e+00> : vector<2x16xf32>
    %48 = tpu.matmul %13, %47, %cst_31 {dimension_numbers = #tpu.dot_dimension_numbers<[1], [0], [0], [1], [0, 0, 1, 1], [], []>} : vector<2x4xf32>, vector<4x16xf32>, vector<2x16xf32> -> vector<2x16xf32>
    %cst_32 = arith.constant dense<0xFF800000> : vector<2xf32>
    %49 = vector.multi_reduction <maximumf>, %48, %cst_32 [1] : vector<2x16xf32> to vector<2xf32>
    %50 = vector.shape_cast %49 : vector<2xf32> to vector<2x1xf32>
    %51 = vector.broadcast %50 : vector<2x1xf32> to vector<2x16xf32>
    %52 = arith.subf %48, %51 : vector<2x16xf32>
    %53 = math.exp %52 : vector<2x16xf32>
    %cst_33 = arith.constant dense<0.000000e+00> : vector<2xf32>
    %54 = vector.multi_reduction <add>, %53, %cst_33 [1] : vector<2x16xf32> to vector<2xf32>
    %55 = vector.shape_cast %54 : vector<2xf32> to vector<2x1xf32>
    %56 = vector.broadcast %55 : vector<2x1xf32> to vector<2x16xf32>
    %57 = arith.divf %53, %56 : vector<2x16xf32>
    %c0_34 = arith.constant 0 : index
    %c0_35 = arith.constant 0 : index
    %58 = vector.load %arg3[%c0_34, %c0_35] : memref<2x16xf32, #tpu.memory_space<vmem>>, vector<2x16xf32>
    tpu.vector_store %arg3[%c0_34, %c0_35], %57 {strides = array<i32>} : memref<2x16xf32, #tpu.memory_space<vmem>>, vector<2x16xf32>,
    return
  }
}

</mosaic_0001>

<bundles_post_ra>
// kernel: tpu_custom_call.1
= control target key start
LH: loop header
LB: loop body
LE: loop exit
PB: predicated region body
PF: predicated region fallthrough
CT: control target
= control target key end

     0   :  { %9 = vsyncpa [#allocation3], 0  ;;  %vm35_vm0 = vcmask 130048   ;;  %s1265_s0 = inlined_call_operand.vmem [shape: f32[64,16], index: 0, kind: input, shape index: {}]   ;;  %s1266_s1 = inlined_call_operand.vmem [shape: f32[48,16], index: 1, kind: input, shape index: {}]   ;;  %s1267_s2 = inlined_call_operand.hbm [shape: f32[4,4], index: 2, kind: output, shape index: {0}]   ;;  %s1268_s3 = inlined_call_operand.hbm [shape: f32[2,16], index: 3, kind: output, shape index: {1}]  }
   0x1   :  { %v30_v0 = vld [vmem:[%s1266_s1 + $0x18] sm:$0xff]  ;;  %v29_v1 = vld [vmem:[%s1266_s1 + $0x10] sm:$0xff]  ;;  %v27_v2 = vld [vmem:[%s1266_s1] sm:$0xff] }
   0x2   :  { %1005 = vmatprep.subr.mxu0 %v30_v0  ;;  %1009 = vmatprep.mubr.msk.f32.mxu0 %vm35_vm0, %v27_v2 }
   0x3   :  { %10 = vsyncpa [#allocation5], 0  ;;  %1006 = vmatpush3.msra.mxu0 %v30_v0  ;;  %v28_v3 = vld [vmem:[%s1266_s1 + $0x8] sm:$0xff]  ;;  %v15_v4 = vld [vmem:[%s1265_s0] sm:$0xff]  ;;  %vm121_vm1 = vcmask 64512   ;;  %v1128_v18 = vmov 0.0  }
   0x4   :  { %1007 = vmatprep.subr.mxu0 %v29_v1  ;;  %1012 = vmatprep.subr.mxu1 %v15_v4  ;;  %v952_v7 = vld [vmem:[%s1265_s0 + $0x3c] ss:$0 sm:$0xff]  ;;  %v17_v14 = vld [vmem:[%s1265_s0 + $0x10] sm:$0xff]  ;;  %v16_v15 = vld [vmem:[%s1265_s0 + $0x8] sm:$0xff]  ;;  %vm1129_vm2 = vmmov 0   ;;  %vm515_vm3 = vcmask 27648  }
   0x5   :  { %1008 = vmatpush3.msra.mxu0 %v29_v1  ;;  %1013 = vmatpush3.msra.mxu1 %v15_v4  ;;  %v22_v19 = vld [vmem:[%s1265_s0 + $0x34] sm:$0xff]  ;;  %v957_v20 = vld [vmem:[%s1265_s0 + $0x3d] ss:$0 sm:$0xff]  ;;  %v31_v25 = vld [vmem:[%s1266_s1 + $0x20] sm:$0xf]  ;;  %vm532_vm4 = vcmask 1043456  }
   0x6   :  { %1010 = vmatmul.mubr.msk.f32.vlgmr.msra.gmra.mxu0 %vm35_vm0, %v28_v3  ;;  %1024 = vmatprep.subr.mxu0 %v17_v14  ;;  %v21_v26 = vld [vmem:[%s1265_s0 + $0x2c] sm:$0xff]  ;;  %v961_v29 = vld [vmem:[%s1265_s0 + $0x3f] ss:$0 sm:$0xff]  ;;  %v32_v42 = vld [vmem:[%s1266_s1 + $0x24] sm:$0xf]  ;;  %vm528_vm5 = vcmask 31744  }
   0x7   :  { %1025 = vmatpush3.msra.mxu0 %v17_v14  ;;  %v18_v43 = vld [vmem:[%s1265_s0 + $0x18] sm:$0xf]  ;;  %v20_v46 = vld [vmem:[%s1265_s0 + $0x24] sm:$0xff]  ;;  %v19_v52 = vld [vmem:[%s1265_s0 + $0x1c] sm:$0xff]  ;;  %vm909_vm6 = vcmask 123904  }
   0x8   :  { %1026 = vmatprep.subr.mxu0 %v16_v15  ;;  %v34_v47 = vld [vmem:[%s1266_s1 + $0x2a] sm:$0xf]  ;;  %v969_v55 = vld [vmem:[%s1265_s0 + $0x3e] ss:$0 sm:$0xff]  ;;  %v33_v58 = vld [vmem:[%s1266_s1 + $0x28] sm:$0x3] }
   0x9   :  { %1027 = vmatpush3.msra.mxu0 %v16_v15  ;;  %s1130_s0 = smov [#allocation2]  }
   0xa   :  { %1038 = vmatprep.subr.mxu0 %v1128_v18  ;;  %s928_s1 = sshll.u32 %s1130_s0, 4  ;;  %s929_s1 = int_to_ptr.vmem [resolvable:$true] %s928_s1 }
   0xb   :  { %s1084_s25 = scalar_lea.vmem %s929_s1, 64  ;;  %p1089_p1 = scmp.lt.s32.totalorder %s929_s1, %s929_s1 }
   0xc   :  { %p1085_p0 = scmp.ne.s32.totalorder %s929_s1, %s1084_s25  ;;  %p1090_p2 = scmp.lt.s32.totalorder %s1084_s25, %s1084_s25 }
   0xe   :  { %p1091_p3 = por %p1090_p2, %p1089_p1 }
  0x10   :  { %p1092_p4 = pnand %p1091_p3, %p1085_p0 }
  0xc6   :  { %v1011_v5 = vpop.f32.mrf.mxu0 }
  0xc8   :  { %v108_v6 = vpop.f32.mrf.mxu0 }
  0xc9   :  { %1014 = vmatprep.mubr.msk.f32.mxu1 %vm121_vm1, %v108_v6 }
  0xca   :  { %1015 = vmatmul.mubr.msk.f32.vlgmr.msra.gmra.mxu1 %vm121_vm1, %v1011_v5 }
  0xcb   :  { %1021 = vmatprep.mubr.msk.f32.mxu1 %vm35_vm0, %v27_v2 }
 0x18a   :  { %v1016_v8 = vpop.f32.mrf.mxu1 }
 0x18b   :  { %v200_v9 = vadd.f32 %v1016_v8, %v952_v7 }
 0x18c   :  { %v194_v10 = vpop.f32.mrf.mxu1 }
 0x18d   :  { %v204_v11 = vmax.f32 %v200_v9, 0.0  ;;  %v195_v12 = vadd.f32 %v952_v7, %v194_v10 }
 0x18f   :  { %v203_v13 = vmax.f32 %v195_v12, 0.0  ;;  %1017 = vmatprep.subr.mxu1 %v204_v11 }
 0x190   :  { %1018 = vmatpush3.msra.mxu1 %v204_v11 }
 0x191   :  { %1019 = vmatprep.subr.mxu1 %v203_v13 }
 0x192   :  { %1020 = vmatpush3.msra.mxu1 %v203_v13 }
 0x193   :  { %1022 = vmatmul.mubr.msk.f32.vlgmr.msra.gmra.mxu1 %vm35_vm0, %v28_v3  ;;  %1031 = vmatprep.subr.mxu1 %v1128_v18 }
 0x194   :  { %1035 = vmatprep.mubr.msk.f32.mxu1 %vm1129_vm2, %v1128_v18 }
 0x253   :  { %v1023_v16 = vpop.f32.mrf.mxu1 }
 0x255   :  { %v271_v17 = vpop.f32.mrf.mxu1 }
 0x256   :  { %1028 = vmatprep.mubr.msk.f32.mxu0 %vm35_vm0, %v271_v17 }
 0x257   :  { %1029 = vmatmul.mubr.msk.f32.vlgmr.msra.gmra.mxu0 %vm35_vm0, %v1023_v16 }
 0x258   :  { %1042 = vmatprep.mubr.msk.f32.mxu0 %vm1129_vm2, %v1128_v18  ;;  %1039 = vmatpush3.msra.mxu0 %v22_v19 }
 0x259   :  { %1040 = vmatprep.subr.mxu0 %v1128_v18 }
 0x25a   :  { %1041 = vmatpush3.msra.mxu0 %v21_v26 }
 0x25b   :  { %1050 = vmatprep.subr.mxu0 %v1128_v18 }
 0x317   :  { %v1030_v21 = vpop.f32.mrf.mxu0 }
 0x318   :  { %v362_v22 = vadd.f32 %v1030_v21, %v957_v20 }
 0x319   :  { %v356_v23 = vpop.f32.mrf.mxu0 }
 0x31a   :  { %v357_v24 = vadd.f32 %v957_v20, %v356_v23  ;;  %1032 = vmatpush3.msra.mxu1 %v362_v22 }
 0x31b   :  { %1033 = vmatprep.subr.mxu1 %v1128_v18 }
 0x31c   :  { %1034 = vmatpush3.msra.mxu1 %v357_v24 }
 0x31d   :  { %1036 = vmatmul.mubr.msk.f32.vlgmr.msra.gmra.mxu1 %vm35_vm0, %v31_v25  ;;  %1045 = vmatprep.subr.mxu1 %v1128_v18 }
 0x31e   :  { %1047 = vmatprep.mubr.msk.f32.mxu1 %vm1129_vm2, %v1128_v18 }
 0x3dd   :  { %v434_v27 = vpop.f32.mrf.mxu1 }
 0x3de   :  { %1043 = vmatmul.mubr.msk.f32.vlgmr.msra.gmra.mxu0 %vm35_vm0, %v434_v27 }
 0x3df   :  { %v1037_v28 = vpop.f32.mrf.mxu1  ;;  %1052 = vmatprep.mubr.msk.f32.mxu0 %vm1129_vm2, %v1128_v18  ;;  %1051 = vmatpush3.msk.msra.mxu0 %vm532_vm4, %v18_v43 }
 0x3e0   :  { %1060 = vmatprep.subr.mxu0 %v1128_v18 }
 0x49e   :  { %v511_v30 = vpop.f32.mrf.mxu0 }
 0x49f   :  { %v512_v31 = vadd.f32 %v961_v29, %v511_v30 }
 0x4a0   :  { %v1044_v32 = vpop.f32.mrf.mxu0 }
 0x4a1   :  { %v516_v33 = vsel %vm515_vm3, %v512_v31, -inf }
 0x4a2   :  { %517 = vmax.xlane.f32.xlu0 %v516_v33 }
 0x52b   :  { %v518_v34 = vpop.xlane.xlu0 %517 }
 0x52c   :  { %v519_v35 = vsub.f32 %v512_v31, %v518_v34 }
 0x52e   :  { %v520_v36 = vmul.f32 1.442695, %v519_v35 }
 0x530   :  { %1076 = vpow2.f32 %v520_v36 }
 0x53d   :  { %v1077_v37 = vpop.eup %1076 }
 0x53e   :  { %v522_v38 = vsel %vm515_vm3, %v1077_v37, 0.0 }
 0x53f   :  { %523 = vadd.xlane.f32.xlu0 %v522_v38 }
 0x5c8   :  { %v524_v39 = vpop.xlane.xlu0 %523 }
 0x5c9   :  { %1078 = vrcp.f32 %v524_v39 }
 0x5d6   :  { %v1079_v40 = vpop.eup %1078 }
 0x5d7   :  { %v526_v41 = vmul.f32 %v1079_v40, %v1077_v37 }
 0x5d9   :  { %1046 = vmatpush3.msk.msra.mxu1 %vm532_vm4, %v526_v41  ;;  %527 = vst.msk [vmem:[#allocation2] sm:$0xf] %vm515_vm3, %v526_v41 }
 0x5da   :  { %1048 = vmatmul.mubr.msk.f32.vlgmr.msra.gmra.mxu1 %vm528_vm5, %v32_v42  ;;  %1055 = vmatprep.subr.mxu1 %v1128_v18 }
 0x5db   :  { %1057 = vmatprep.mubr.msk.f32.mxu1 %vm1129_vm2, %v1128_v18 }
 0x69a   :  { %v602_v44 = vpop.f32.mrf.mxu1 }
 0x69b   :  { %1053 = vmatmul.mubr.msk.f32.vlgmr.msra.gmra.mxu0 %vm528_vm5, %v602_v44 }
 0x69c   :  { %v1049_v45 = vpop.f32.mrf.mxu1  ;;  %1064 = vmatprep.mubr.msk.f32.mxu0 %vm1129_vm2, %v1128_v18  ;;  %1061 = vmatpush3.msra.mxu0 %v20_v46 }
 0x69d   :  { %1062 = vmatprep.subr.mxu0 %v1128_v18 }
 0x69e   :  { %1063 = vmatpush3.msra.mxu0 %v19_v52 }
 0x75b   :  { %v678_v48 = vpop.f32.mrf.mxu0 }
 0x75c   :  { %v679_v49 = vadd.f32 %v678_v48, %v34_v47 }
 0x75d   :  { %v1054_v50 = vpop.f32.mrf.mxu0 }
 0x75e   :  { %v682_v51 = vmax.f32 %v679_v49, 0.0 }
 0x760   :  { %1056 = vmatpush3.msk.msra.mxu1 %vm532_vm4, %v682_v51 }
 0x761   :  { %1058 = vmatmul.mubr.msk.f32.vlgmr.msra.gmra.mxu1 %vm528_vm5, %v32_v42  ;;  %1067 = vmatprep.subr.mxu1 %v1128_v18 }
 0x762   :  { %1069 = vmatprep.mubr.msk.f32.mxu1 %vm1129_vm2, %v1128_v18 }
 0x821   :  { %v752_v53 = vpop.f32.mrf.mxu1 }
 0x822   :  { %1065 = vmatmul.mubr.msk.f32.vlgmr.msra.gmra.mxu0 %vm35_vm0, %v752_v53 }
 0x823   :  { %v1059_v54 = vpop.f32.mrf.mxu1 }
 0x8e2   :  { %v829_v56 = vpop.f32.mrf.mxu0 }
 0x8e3   :  { %v830_v57 = vadd.f32 %v969_v55, %v829_v56 }
 0x8e4   :  { %v1066_v59 = vpop.f32.mrf.mxu0 }
 0x8e5   :  { %1068 = vmatpush3.msk.msra.mxu1 %vm532_vm4, %v830_v57 }
 0x8e6   :  { %1070 = vmatmul.mubr.msk.f32.vlgmr.msra.gmra.mxu1 %vm528_vm5, %v33_v58 }
 0x9a6   :  { %v905_v60 = vpop.f32.mrf.mxu1 }
 0x9a7   :  { %v910_v61 = vsel %vm909_vm6, %v905_v60, -inf }
 0x9a8   :  { %911 = vmax.xlane.f32.xlu1 %v910_v61  ;;  %v1071_v62 = vpop.f32.mrf.mxu1 }
 0xa31   :  { %v912_v63 = vpop.xlane.xlu1 %911 }
 0xa32   :  { %v913_v0 = vsub.f32 %v905_v60, %v912_v63 }
 0xa34   :  { %v914_v1 = vmul.f32 1.442695, %v913_v0 }
 0xa36   :  { %1080 = vpow2.f32 %v914_v1 }
 0xa43   :  { %v1081_v2 = vpop.eup %1080 }
 0xa44   :  { %v916_v3 = vsel %vm909_vm6, %v1081_v2, 0.0 }
 0xa45   :  { %917 = vadd.xlane.f32.xlu1 %v916_v3 }
 0xa46   :  { %1095 = shalt.err (!%p1092_p4)
}
 0xa47   :  { %931 = dma.vmem_to_hbm [thread:$0]  %s929_s1, 64, %s1267_s2, [#allocation3]  }
 0xa48   :  { %s1131_s28 = smov [#allocation4]  }
 0xa49   :  { %s938_s29 = sshll.u32 %s1131_s28, 4  ;;  %s939_s29 = int_to_ptr.vmem [resolvable:$true] %s938_s29 }
 0xa4a   :  { %s1104_s30 = scalar_lea.vmem %s939_s29, 32  ;;  %p1109_p6 = scmp.lt.s32.totalorder %s939_s29, %s939_s29 }
 0xa4b   :  { %p1105_p5 = scmp.ne.s32.totalorder %s939_s29, %s1104_s30  ;;  %p1110_p7 = scmp.lt.s32.totalorder %s1104_s30, %s1104_s30 }
 0xa4d   :  { %p1111_p8 = por %p1110_p7, %p1109_p6 }
 0xa4f   :  { %p1112_p9 = pnand %p1111_p8, %p1105_p5 }
 0xace   :  { %v918_v4 = vpop.xlane.xlu1 %917 }
 0xacf   :  { %1082 = vrcp.f32 %v918_v4 }
 0xadc   :  { %v1083_v5 = vpop.eup %1082 }
 0xadd   :  { %v920_v6 = vmul.f32 %v1083_v5, %v1081_v2 }
 0xadf   :  { %921 = vst.msk [vmem:[#allocation4] sm:$0x3] %vm909_vm6, %v920_v6 }
 0xae0   :  { %1115 = shalt.err (!%p1112_p9)
}
 0xae1   :  { %941 = dma.vmem_to_hbm [thread:$0]  %s939_s29, 32, %s1268_s3, [#allocation5]  }
 0xae2   :  { %1124 = dma.done.wait [#allocation3], 64  }
 0xae3   :  { %1125 = vsyncadd [#allocation3], 4294967232 }
 0xae4   :  { %1126 = dma.done.wait [#allocation5], 32  }
 0xae5   :  { %1127 = vsyncadd [#allocation5], 4294967264 }
 0xae6   :  { %948 = vsyncpa [#allocation3], 1 }
 0xae7   :  { %949 = vsyncpa [#allocation5], 1 }

</bundles_post_ra>
